<compile_context>
chip_gen: v6e
topology: v6e:2x2x1
jax: 0.10.0
libtpu: 0.0.40
codegen_flags: <defaults>
</compile_context>

<pallas_src>
import functools

import jax
import jax.numpy as jnp
import numpy as np
from jax.experimental import pallas as pl
from jax.experimental.pallas import tpu as pltpu


def _round_up(x, m):
    return (x + m - 1) // m * m


def _unpool_kernel(x_ref, idx_ref, tgt_ref, p_ref, o_ref, *, k2, compute_dtype):
    # x_ref:   (T, L_in)             input dtype
    # idx_ref: (T, L_in)             int32 flat indices into the H_out*W_out plane
    # tgt_ref: (k2, L_in)            int32 per-offset compare targets (window origin + code)
    # p_ref:   (k2*L_in, L_out_blk)  0/1 scatter matrix (compute dtype)
    # o_ref:   (T, L_out_blk)        input dtype
    x = x_ref[...].astype(compute_dtype)                 # widen/narrow in-register only
    idx = idx_ref[...]
    tgt = tgt_ref[...]                                   # (k2, L_in)
    zero = jnp.zeros_like(x)

    # k^2 masked selects (VPU), concatenated along the contraction axis.
    pieces = [jnp.where(idx == tgt[oi:oi + 1, :], x, zero) for oi in range(k2)]
    sel = jnp.concatenate(pieces, axis=1)                # (T, k2*L_in)

    # Single MXU matmul with K = k^2 * L_in, scatter to the output plane.
    acc = jnp.dot(sel, p_ref[...], preferred_element_type=jnp.float32)
    o_ref[...] = acc.astype(o_ref.dtype)


def max_unpooling2d(inputs, indices, kernel_size=3, stride=2, padding=0, max_tile_nc=256):
    """Pallas implementation of nn.MaxUnpool2d(kernel_size, stride, padding)."""
    N, C, H_in, W_in = inputs.shape
    H_out = (H_in - 1) * stride - 2 * padding + kernel_size
    W_out = (W_in - 1) * stride - 2 * padding + kernel_size
    L_in = H_in * W_in
    L_out = H_out * W_out
    NC = N * C
    k2 = kernel_size * kernel_size

    in_dtype = inputs.dtype
    itemsize = jnp.dtype(in_dtype).itemsize
    # bf16 inputs: bf16 x bf16 MXU path (exact: P entries are 0/1, f32 accumulate).
    compute_dtype = jnp.bfloat16 if in_dtype == jnp.bfloat16 else jnp.float32
    p_item = jnp.dtype(compute_dtype).itemsize

    # ---- trace-time constants (numpy) ------------------------------------
    pos = np.arange(L_in)
    ii, jj = pos // W_in, pos % W_in
    oh0 = ii * stride - padding                # pooling-window origin per input position
    ow0 = jj * stride - padding

    # ---- L_out tiling: keep the resident P slice under a VMEM budget -------
    LANE = 128
    P_BUDGET = 12 * 1024 * 1024                # per-buffer budget (v7x: 64 MiB physical VMEM)
    row_bytes = k2 * L_in * p_item
    if row_bytes * _round_up(L_out, LANE) <= P_BUDGET:
        lo_tile = L_out                        # exact width: lane-exact store, no wrapper copy
        L_out_p = L_out
    else:
        lo_tile = max(LANE, (P_BUDGET // (row_bytes * LANE)) * LANE)
        L_out_p = _round_up(L_out, lo_tile)
    lo_steps = L_out_p // lo_tile

    # ---- scatter matrix P and per-offset compare targets -------------------
    P = np.zeros((k2 * L_in, L_out_p), np.float32)
    tgt = np.full((k2, L_in), -1, np.int32)    # -1 never matches (indices are >= 0)
    for dy in range(kernel_size):
        for dx in range(kernel_size):
            oi = dy * kernel_size + dx
            oh, ow = oh0 + dy, ow0 + dx
            valid = (oh >= 0) & (oh < H_out) & (ow >= 0) & (ow < W_out)
            q = oh * W_out + ow
            P[oi * L_in + pos[valid], q[valid]] = 1.0
            tgt[oi, valid] = q[valid]
    P_arr = jnp.asarray(P, dtype=compute_dtype)
    tgt_arr = jnp.asarray(tgt)

    # ---- NC tiling (sublane-packed, no padding when NC is already aligned) -
    sub = max(8, 32 // itemsize)               # 8 f32 / 16 bf16 / 32 int8
    NC_r = _round_up(NC, sub)
    cap = min(max(max_tile_nc, sub), NC_r)
    cands = [t for t in range(sub, cap + 1, sub) if NC_r % t == 0]
    tile = max(cands)
    pref = [t for t in cands if t >= 128 and NC_r // t >= 4]   # keep both TCs busy (v7x)
    if pref:
        tile = max(pref)
    nc_steps = NC_r // tile

    x_flat = inputs.reshape(NC, L_in)                        # native dtype, no f32 HBM copy
    idx_flat = indices.reshape(NC, L_in).astype(jnp.int32)
    if NC_r != NC:
        x_flat = jnp.pad(x_flat, ((0, NC_r - NC), (0, 0)))
        idx_flat = jnp.pad(idx_flat, ((0, NC_r - NC), (0, 0)))

    # ---- specs --------------------------------------------------------------
    x_spec = pl.BlockSpec((tile, L_in), lambda g, l: (g, 0))
    idx_spec = pl.BlockSpec((tile, L_in), lambda g, l: (g, 0))
    tgt_spec = pl.BlockSpec((k2, L_in), lambda g, l: (0, 0),
                            pipeline_mode=pl.Buffered(buffer_count=1))
    if lo_steps == 1:
        p_spec = pl.BlockSpec((k2 * L_in, lo_tile), lambda g, l: (0, 0),
                              pipeline_mode=pl.Buffered(buffer_count=1))
    else:
        p_spec = pl.BlockSpec((k2 * L_in, lo_tile), lambda g, l: (0, l))
    out_spec = pl.BlockSpec((tile, lo_tile), lambda g, l: (g, l))

    # ---- VMEM estimate / compiler params ------------------------------------
    lane_pad = lambda n: _round_up(n, LANE)
    p_copies = 1 if lo_steps == 1 else 2
    est_vmem = (
        2 * tile * lane_pad(L_in) * (itemsize + 4)                 # x + idx (double-buffered)
        + 2 * tile * lane_pad(lo_tile) * itemsize                  # out (double-buffered)
        + p_copies * (k2 * L_in) * lane_pad(lo_tile) * p_item      # scatter matrix
        + _round_up(k2, 8) * lane_pad(L_in) * 4                    # targets
        + tile * (k2 * lane_pad(L_in)) * p_item                    # sel working set
        + tile * lane_pad(lo_tile) * 4                             # f32 accumulator
    )
    cp_kwargs = dict(dimension_semantics=("parallel", "arbitrary"))
    if est_vmem > 8 * 1024 * 1024:
        # Raise the scoped VMEM limit for larger feature maps (v5e default is 16 MiB).
        cp_kwargs["vmem_limit_bytes"] = int(min(max(2 * est_vmem, 32 * 1024 * 1024),
                                                100 * 1024 * 1024))

    kernel = functools.partial(_unpool_kernel, k2=k2, compute_dtype=compute_dtype)
    out_flat = pl.pallas_call(
        kernel,
        out_shape=jax.ShapeDtypeStruct((NC_r, L_out_p), in_dtype),
        grid=(nc_steps, lo_steps),
        in_specs=[x_spec, idx_spec, tgt_spec, p_spec],
        out_specs=out_spec,
        compiler_params=pltpu.CompilerParams(**cp_kwargs),
    )(x_flat, idx_flat, tgt_arr, P_arr)

    if NC_r != NC or L_out_p != L_out:
        out_flat = out_flat[:NC, :L_out]
    return out_flat.reshape(N, C, H_out, W_out)


def _reference_unpool(inputs, indices, H_out, W_out):
    """Pure-JAX reference scatter (matches torch.nn.MaxUnpool2d for unique indices)."""
    N, C, H_in, W_in = inputs.shape
    NC, L_in, L_out = N * C, H_in * W_in, H_out * W_out
    xf = inputs.reshape(NC, L_in)
    idxf = indices.reshape(NC, L_in)
    out = jnp.zeros((NC, L_out), inputs.dtype)
    rows = jnp.arange(NC)[:, None]
    out = out.at[rows, idxf].set(xf)
    return out.reshape(N, C, H_out, W_out)


if __name__ == "__main__":
    kernel_size, stride, padding = 3, 2, 0
    N, C, H_in, W_in = 2, 4, 8, 8
    H_out = (H_in - 1) * stride - 2 * padding + kernel_size   # 17
    W_out = (W_in - 1) * stride - 2 * padding + kernel_size   # 17

    key = jax.random.PRNGKey(0)
    x = jax.random.normal(key, (N, C, H_in, W_in), dtype=jnp.float32)

    # Deterministic MaxPool2d-consistent indices that exercise all 9 (dy, dx) window
    # offsets while staying unique within each plane: the per-row/col offset pattern
    # [0, 2, 1] never produces the colliding "2 then 0" adjacency of overlapping
    # kernel=3 / stride=2 windows, so no flat output index repeats.
    off = jnp.array([0, 2, 1], jnp.int32)
    dy = off[jnp.arange(H_in) % 3][:, None]
    dx = off[jnp.arange(W_in) % 3][None, :]
    r = jnp.arange(H_in, dtype=jnp.int32)[:, None] * stride + dy
    c = jnp.arange(W_in, dtype=jnp.int32)[None, :] * stride + dx
    indices = jnp.broadcast_to((r * W_out + c).astype(jnp.int32), (N, C, H_in, W_in))

    out = max_unpooling2d(x, indices, kernel_size, stride, padding)
    out = jax.block_until_ready(out)

    ref = _reference_unpool(x, indices, H_out, W_out)
    assert out.shape == (N, C, H_out, W_out), out.shape
    assert out.dtype == x.dtype, out.dtype
    assert jnp.allclose(out, ref, atol=1e-5), "mismatch vs reference scatter"

    print("KERNEL_OK")
</pallas_src>

<mosaic_0001>
module attributes {stable_mosaic.version = 11 : i64} {
  func.func @_unpool_kernel(%arg0: i32, %arg1: i32, %arg2: memref<8x64xf32, #tpu.memory_space<vmem>>, %arg3: memref<8x64xi32, #tpu.memory_space<vmem>>, %arg4: memref<9x64xi32, #tpu.memory_space<vmem>>, %arg5: memref<576x289xf32, #tpu.memory_space<vmem>>, %arg6: memref<8x289xf32, #tpu.memory_space<vmem>>) attributes {dimension_semantics = [#tpu.dimension_semantics<parallel>, #tpu.dimension_semantics<arbitrary>], iteration_bounds = array<i64: 1, 1>, scalar_prefetch = 0 : i64, scratch_operands = 0 : i64, tpu.core_type = #tpu.core_type<tc>, window_params = [{transform_indices = @transform_0, window_bounds = array<i64: 8, 64>}, {transform_indices = @transform_1, window_bounds = array<i64: 8, 64>}, {pipeline_mode = #tpu.pipeline_mode<synchronous>, transform_indices = @transform_2, window_bounds = array<i64: 9, 64>}, {pipeline_mode = #tpu.pipeline_mode<synchronous>, transform_indices = @transform_3, window_bounds = array<i64: 576, 289>}, {transform_indices = @transform_4, window_bounds = array<i64: 8, 289>}]} {
    %c0 = arith.constant 0 : index
    %c0_0 = arith.constant 0 : index
    %0 = vector.load %arg2[%c0, %c0_0] : memref<8x64xf32, #tpu.memory_space<vmem>>, vector<8x64xf32>
    %c0_1 = arith.constant 0 : index
    %c0_2 = arith.constant 0 : index
    %1 = vector.load %arg3[%c0_1, %c0_2] : memref<8x64xi32, #tpu.memory_space<vmem>>, vector<8x64xi32>
    %c0_3 = arith.constant 0 : index
    %c0_4 = arith.constant 0 : index
    %2 = vector.load %arg4[%c0_3, %c0_4] : memref<9x64xi32, #tpu.memory_space<vmem>>, vector<9x64xi32>
    %cst = arith.constant 0.000000e+00 : f32
    %3 = vector.broadcast %cst : f32 to vector<8x64xf32>
    %4 = vector.extract_strided_slice %2 {offsets = [0, 0], sizes = [1, 64], strides = [1, 1]} : vector<9x64xi32> to vector<1x64xi32>
    %5 = vector.broadcast %4 : vector<1x64xi32> to vector<8x64xi32>
    %6 = arith.cmpi eq, %1, %5 : vector<8x64xi32>
    %7 = arith.select %6, %0, %3 : vector<8x64xi1>, vector<8x64xf32>
    %8 = vector.extract_strided_slice %2 {offsets = [1, 0], sizes = [1, 64], strides = [1, 1]} : vector<9x64xi32> to vector<1x64xi32>
    %9 = vector.broadcast %8 : vector<1x64xi32> to vector<8x64xi32>
    %10 = arith.cmpi eq, %1, %9 : vector<8x64xi32>
    %11 = arith.select %10, %0, %3 : vector<8x64xi1>, vector<8x64xf32>
    %12 = vector.extract_strided_slice %2 {offsets = [2, 0], sizes = [1, 64], strides = [1, 1]} : vector<9x64xi32> to vector<1x64xi32>
    %13 = vector.broadcast %12 : vector<1x64xi32> to vector<8x64xi32>
    %14 = arith.cmpi eq, %1, %13 : vector<8x64xi32>
    %15 = arith.select %14, %0, %3 : vector<8x64xi1>, vector<8x64xf32>
    %16 = vector.extract_strided_slice %2 {offsets = [3, 0], sizes = [1, 64], strides = [1, 1]} : vector<9x64xi32> to vector<1x64xi32>
    %17 = vector.broadcast %16 : vector<1x64xi32> to vector<8x64xi32>
    %18 = arith.cmpi eq, %1, %17 : vector<8x64xi32>
    %19 = arith.select %18, %0, %3 : vector<8x64xi1>, vector<8x64xf32>
    %20 = vector.extract_strided_slice %2 {offsets = [4, 0], sizes = [1, 64], strides = [1, 1]} : vector<9x64xi32> to vector<1x64xi32>
    %21 = vector.broadcast %20 : vector<1x64xi32> to vector<8x64xi32>
    %22 = arith.cmpi eq, %1, %21 : vector<8x64xi32>
    %23 = arith.select %22, %0, %3 : vector<8x64xi1>, vector<8x64xf32>
    %24 = vector.extract_strided_slice %2 {offsets = [5, 0], sizes = [1, 64], strides = [1, 1]} : vector<9x64xi32> to vector<1x64xi32>
    %25 = vector.broadcast %24 : vector<1x64xi32> to vector<8x64xi32>
    %26 = arith.cmpi eq, %1, %25 : vector<8x64xi32>
    %27 = arith.select %26, %0, %3 : vector<8x64xi1>, vector<8x64xf32>
    %28 = vector.extract_strided_slice %2 {offsets = [6, 0], sizes = [1, 64], strides = [1, 1]} : vector<9x64xi32> to vector<1x64xi32>
    %29 = vector.broadcast %28 : vector<1x64xi32> to vector<8x64xi32>
    %30 = arith.cmpi eq, %1, %29 : vector<8x64xi32>
    %31 = arith.select %30, %0, %3 : vector<8x64xi1>, vector<8x64xf32>
    %32 = vector.extract_strided_slice %2 {offsets = [7, 0], sizes = [1, 64], strides = [1, 1]} : vector<9x64xi32> to vector<1x64xi32>
    %33 = vector.broadcast %32 : vector<1x64xi32> to vector<8x64xi32>
    %34 = arith.cmpi eq, %1, %33 : vector<8x64xi32>
    %35 = arith.select %34, %0, %3 : vector<8x64xi1>, vector<8x64xf32>
    %36 = vector.extract_strided_slice %2 {offsets = [8, 0], sizes = [1, 64], strides = [1, 1]} : vector<9x64xi32> to vector<1x64xi32>
    %37 = vector.broadcast %36 : vector<1x64xi32> to vector<8x64xi32>
    %38 = arith.cmpi eq, %1, %37 : vector<8x64xi32>
    %39 = arith.select %38, %0, %3 : vector<8x64xi1>, vector<8x64xf32>
    %40 = tpu.concatenate %7, %11, %15, %19, %23, %27, %31, %35, %39 in 1 : vector<8x64xf32>, vector<8x64xf32>, vector<8x64xf32>, vector<8x64xf32>, vector<8x64xf32>, vector<8x64xf32>, vector<8x64xf32>, vector<8x64xf32>, vector<8x64xf32> -> vector<8x576xf32>
    %c0_5 = arith.constant 0 : index
    %c0_6 = arith.constant 0 : index
    %41 = vector.load %arg5[%c0_5, %c0_6] : memref<576x289xf32, #tpu.memory_space<vmem>>, vector<576x289xf32>
    %cst_7 = arith.constant dense<0.000000e+00> : vector<8x289xf32>
    %42 = tpu.matmul %40, %41, %cst_7 {dimension_numbers = #tpu.dot_dimension_numbers<[1], [0], [0], [1], [0, 0, 1, 1], [], []>} : vector<8x576xf32>, vector<576x289xf32>, vector<8x289xf32> -> vector<8x289xf32>
    %c0_8 = arith.constant 0 : index
    %c0_9 = arith.constant 0 : index
    %43 = vector.load %arg6[%c0_8, %c0_9] : memref<8x289xf32, #tpu.memory_space<vmem>>, vector<8x289xf32>
    tpu.vector_store %arg6[%c0_8, %c0_9], %42 {strides = array<i32>} : memref<8x289xf32, #tpu.memory_space<vmem>>, vector<8x289xf32>,
    return
  }
  func.func @transform_0(%arg0: i32, %arg1: i32) -> (i32, i32) {
    %c0_i32 = arith.constant 0 : i32
    %c0_i32_0 = arith.constant 0 : i32
    return %arg0, %c0_i32 : i32, i32
  }
  func.func @transform_1(%arg0: i32, %arg1: i32) -> (i32, i32) {
    %c0_i32 = arith.constant 0 : i32
    %c0_i32_0 = arith.constant 0 : i32
    return %arg0, %c0_i32 : i32, i32
  }
  func.func @transform_2(%arg0: i32, %arg1: i32) -> (i32, i32) {
    %c0_i32 = arith.constant 0 : i32
    %c0_i32_0 = arith.constant 0 : i32
    %c0_i32_1 = arith.constant 0 : i32
    return %c0_i32, %c0_i32_0 : i32, i32
  }
  func.func @transform_3(%arg0: i32, %arg1: i32) -> (i32, i32) {
    %c0_i32 = arith.constant 0 : i32
    %c0_i32_0 = arith.constant 0 : i32
    %c0_i32_1 = arith.constant 0 : i32
    return %c0_i32, %c0_i32_0 : i32, i32
  }
  func.func @transform_4(%arg0: i32, %arg1: i32) -> (i32, i32) {
    %c0_i32 = arith.constant 0 : i32
    return %arg0, %arg1 : i32, i32
  }
}

</mosaic_0001>

<bundles_post_ra>
// kernel: tpu_custom_call.1
= control target key start
LH: loop header
LB: loop body
LE: loop exit
PB: predicated region body
PF: predicated region fallthrough
CT: control target
= control target key end

     0   :  { %v22_v0 = vlaneseq  ;;  %s894_s11 = smov 64   ;;  %s1672_s0 = inlined_call_operand.vmem [shape: f32[8,64], index: 0, kind: input, shape index: {}]   ;;  %s1673_s1 = inlined_call_operand.vmem [shape: s32[8,64], index: 1, kind: input, shape index: {}]   ;;  %s1674_s2 = inlined_call_operand.vmem [shape: s32[9,64], index: 2, kind: input, shape index: {}]   ;;  %s1675_s3 = inlined_call_operand.vmem [shape: f32[576,289], index: 3, kind: input, shape index: {}]   ;;  %s1676_s4 = inlined_call_operand.hbm [shape: f32[8,289], index: 4, kind: output, shape index: {}]  }
   0x1   :  { %v143_v1 = vld [vmem:[%s1675_s3 + $0x170] sm:$0xff]  ;;  %v142_v2 = vld [vmem:[%s1675_s3 + $0x168] sm:$0xff]  ;;  %v140_v3 = vld [vmem:[%s1675_s3 + $0x158] sm:$0xff] }
   0x2   :  { %v932_v4 = vshrl.u32 %v22_v0, 7  ;;  %316 = vmatprep.subr.mxu0 %v143_v1  ;;  %v139_v5 = vld [vmem:[%s1675_s3 + $0x150] sm:$0xff]  ;;  %v943_v7 = vld [vmem:[%s1674_s2] sm:$0xff]  ;;  %v238_v9 = vld [vmem:[%s1675_s3 + $0x468] sm:$0xff] }
   0x3   :  { %v239_v6 = vld [vmem:[%s1675_s3 + $0x470] sm:$0xff]  ;;  %317 = vmatpush1.msra.mxu0 %v142_v2  ;;  %v137_v8 = vld [vmem:[%s1675_s3 + $0x140] sm:$0xff]  ;;  %v136_v14 = vld [vmem:[%s1675_s3 + $0x138] sm:$0xff] }
   0x4   :  { %387 = vmatprep.subr.mxu1 %v239_v6  ;;  %v30_v10 = vsub.s32 1, %v932_v4  ;;  %v42_v11 = vsub.s32 3, %v932_v4  ;;  %v54_v12 = vsub.s32 5, %v932_v4  ;;  %v66_v13 = vsub.s32 7, %v932_v4  ;;  %318 = vmatprep.subr.mxu0 %v140_v3  ;;  %v236_v15 = vld [vmem:[%s1675_s3 + $0x458] sm:$0xff]  ;;  %v964_v16 = vld [vmem:[%s1673_s1] sm:$0xff] }
   0x5   :  { %388 = vmatpush1.msra.mxu1 %v238_v9  ;;  %319 = vmatpush1.msra.mxu0 %v139_v5  ;;  %v134_v17 = vld [vmem:[%s1675_s3 + $0x128] sm:$0xff]  ;;  %v235_v18 = vld [vmem:[%s1675_s3 + $0x450] sm:$0xff]  ;;  %v36_v19 = vsub.s32 2, %v932_v4  ;;  %v24_v20 = vsub.s32 0, %v932_v4  ;;  %v60_v21 = vsub.s32 6, %v932_v4  ;;  %v978_v22 = vld [vmem:[%s1672_s0] sm:$0xff] }
   0x6   :  { %389 = vmatprep.subr.mxu1 %v236_v15  ;;  %v31_v23 = vrot.slane %v943_v7, %v30_v10  ;;  %v43_v24 = vrot.slane %v943_v7, %v42_v11  ;;  %v55_v25 = vrot.slane %v943_v7, %v54_v12  ;;  %v67_v26 = vrot.slane %v943_v7, %v66_v13  ;;  %v133_v27 = vld [vmem:[%s1675_s3 + $0x120] sm:$0xff]  ;;  %v131_v29 = vld [vmem:[%s1675_s3 + $0x110] sm:$0xff]  ;;  %v232_v30 = vld [vmem:[%s1675_s3 + $0x438] sm:$0xff] }
   0x7   :  { %320 = vmatprep.subr.mxu0 %v137_v8  ;;  %v233_v28 = vld [vmem:[%s1675_s3 + $0x440] sm:$0xff]  ;;  %390 = vmatpush1.msra.mxu1 %v235_v18  ;;  %v37_v31 = vrot.slane %v943_v7, %v36_v19  ;;  %v25_v32 = vrot.slane %v943_v7, %v24_v20  ;;  %v61_v33 = vrot.slane %v943_v7, %v60_v21  ;;  %v48_v34 = vsub.s32 4, %v932_v4  ;;  %v130_v35 = vld [vmem:[%s1675_s3 + $0x108] sm:$0xff]  ;;  %v128_v41 = vld [vmem:[%s1675_s3 + $0xf8] sm:$0xff] }
   0x8   :  { %321 = vmatpush1.msra.mxu0 %v136_v14  ;;  %vm32_vm0 = vcmp.eq.s32.totalorder %v964_v16, %v31_v23  ;;  %vm44_vm1 = vcmp.eq.s32.totalorder %v964_v16, %v43_v24  ;;  %vm56_vm2 = vcmp.eq.s32.totalorder %v964_v16, %v55_v25  ;;  %vm68_vm3 = vcmp.eq.s32.totalorder %v964_v16, %v67_v26  ;;  %v230_v36 = vld [vmem:[%s1675_s3 + $0x428] sm:$0xff]  ;;  %v127_v43 = vld [vmem:[%s1675_s3 + $0xf0] sm:$0xff]  ;;  %v229_v44 = vld [vmem:[%s1675_s3 + $0x420] sm:$0xff] }
   0x9   :  { %322 = vmatprep.subr.mxu0 %v134_v17  ;;  %v33_v37 = vsel %vm32_vm0, %v978_v22, 0.0  ;;  %v45_v38 = vsel %vm44_vm1, %v978_v22, 0.0  ;;  %v57_v39 = vsel %vm56_vm2, %v978_v22, 0.0  ;;  %v69_v40 = vsel %vm68_vm3, %v978_v22, 0.0  ;;  %391 = vmatprep.subr.mxu1 %v233_v28  ;;  %v125_v45 = vld [vmem:[%s1675_s3 + $0xe0] sm:$0xff]  ;;  %v227_v46 = vld [vmem:[%s1675_s3 + $0x410] sm:$0xff] }
   0xa   :  { %323 = vmatpush1.msra.mxu0 %v133_v27  ;;  %v862_v42 = vpack.i.bf16 %v33_v37, %v45_v38  ;;  %392 = vmatpush1.msra.mxu1 %v232_v30  ;;  %vm38_vm4 = vcmp.eq.s32.totalorder %v964_v16, %v37_v31  ;;  %vm26_vm5 = vcmp.eq.s32.totalorder %v964_v16, %v25_v32  ;;  %v124_v50 = vld [vmem:[%s1675_s3 + $0xd8] sm:$0xff]  ;;  %v226_v51 = vld [vmem:[%s1675_s3 + $0x408] sm:$0xff]  ;;  %v121_v56 = vld [vmem:[%s1675_s3 + $0xc0] sm:$0xff] }
   0xb   :  { %324 = vmatprep.subr.mxu0 %v131_v29  ;;  %393 = vmatprep.subr.mxu1 %v230_v36  ;;  %v1031_v47 = vsel %vm38_vm4, %v978_v22, 0.0  ;;  %vm62_vm6 = vcmp.eq.s32.totalorder %v964_v16, %v61_v33  ;;  %v49_v48 = vrot.slane %v943_v7, %v48_v34  ;;  %v867_v49 = vpack.i.bf16 %v57_v39, %v69_v40  ;;  %v122_v54 = vld [vmem:[%s1675_s3 + $0xc8] sm:$0xff]  ;;  %v224_v55 = vld [vmem:[%s1675_s3 + $0x3f8] sm:$0xff]  ;;  %v223_v58 = vld [vmem:[%s1675_s3 + $0x3f0] sm:$0xff] }
   0xc   :  { %325 = vmatpush1.msra.mxu0 %v130_v35  ;;  %863 = vrot.lane.b32.xlu0 %v862_v42, %s894_s11  ;;  %v1043_v52 = vsel %vm26_vm5, %v978_v22, 0.0  ;;  %v1046_v53 = vsel %vm62_vm6, %v978_v22, 0.0  ;;  %v119_v59 = vld [vmem:[%s1675_s3 + $0xb0] sm:$0xff]  ;;  %v221_v60 = vld [vmem:[%s1675_s3 + $0x3e0] sm:$0xff]  ;;  %v118_v61 = vld [vmem:[%s1675_s3 + $0xa8] sm:$0xff] }
   0xd   :  { %326 = vmatprep.subr.mxu0 %v128_v41  ;;  %394 = vmatpush1.msra.mxu1 %v229_v44  ;;  %vm50_vm7 = vcmp.eq.s32.totalorder %v964_v16, %v49_v48  ;;  %v220_v62 = vld [vmem:[%s1675_s3 + $0x3d8] sm:$0xff]  ;;  %v218_v0 = vld [vmem:[%s1675_s3 + $0x3c8] sm:$0xff]  ;;  %v115_v1 = vld [vmem:[%s1675_s3 + $0x90] sm:$0xff] }
   0xe   :  { %327 = vmatpush1.msra.mxu0 %v127_v43  ;;  %395 = vmatprep.subr.mxu1 %v227_v46  ;;  %v1059_v57 = vsel %vm50_vm7, %v978_v22, 0.0  ;;  %v116_v63 = vld [vmem:[%s1675_s3 + $0x98] sm:$0xff]  ;;  %v217_v2 = vld [vmem:[%s1675_s3 + $0x3c0] sm:$0xff]  ;;  %v215_v4 = vld [vmem:[%s1675_s3 + $0x3b0] sm:$0xff] }
   0xf   :  { %328 = vmatprep.subr.mxu0 %v125_v45  ;;  %396 = vmatpush1.msra.mxu1 %v226_v51  ;;  %v113_v3 = vld [vmem:[%s1675_s3 + $0x80] sm:$0xff]  ;;  %v112_v5 = vld [vmem:[%s1675_s3 + $0x78] sm:$0xff]  ;;  %v214_v6 = vld [vmem:[%s1675_s3 + $0x3a8] sm:$0xff] }
  0x10   :  { %329 = vmatpush1.msra.mxu0 %v124_v50  ;;  %868 = vrot.lane.b32.xlu0 %v867_v49, %s894_s11  ;;  %v110_v7 = vld [vmem:[%s1675_s3 + $0x68] sm:$0xff]  ;;  %v212_v8 = vld [vmem:[%s1675_s3 + $0x398] sm:$0xff]  ;;  %v109_v9 = vld [vmem:[%s1675_s3 + $0x60] sm:$0xff] }
  0x11   :  { %330 = vmatprep.subr.mxu0 %v122_v54  ;;  %397 = vmatprep.subr.mxu1 %v224_v55  ;;  %v211_v10 = vld [vmem:[%s1675_s3 + $0x390] sm:$0xff]  ;;  %v209_v12 = vld [vmem:[%s1675_s3 + $0x380] sm:$0xff]  ;;  %v106_v13 = vld [vmem:[%s1675_s3 + $0x48] sm:$0xff] }
  0x12   :  { %331 = vmatpush1.msra.mxu0 %v121_v56  ;;  %398 = vmatpush1.msra.mxu1 %v223_v58  ;;  %v107_v11 = vld [vmem:[%s1675_s3 + $0x50] sm:$0xff]  ;;  %v208_v14 = vld [vmem:[%s1675_s3 + $0x378] sm:$0xff]  ;;  %v206_v17 = vld [vmem:[%s1675_s3 + $0x368] sm:$0xff] }
  0x13   :  { %332 = vmatprep.subr.mxu0 %v119_v59  ;;  %399 = vmatprep.subr.mxu1 %v221_v60  ;;  %v104_v15 = vld [vmem:[%s1675_s3 + $0x38] sm:$0xff]  ;;  %v103_v18 = vld [vmem:[%s1675_s3 + $0x30] sm:$0xff]  ;;  %v205_v19 = vld [vmem:[%s1675_s3 + $0x360] sm:$0xff] }
  0x14   :  { %333 = vmatpush1.msra.mxu0 %v118_v61  ;;  %400 = vmatpush1.msra.mxu1 %v220_v62  ;;  %v101_v20 = vld [vmem:[%s1675_s3 + $0x20] sm:$0xff]  ;;  %v203_v21 = vld [vmem:[%s1675_s3 + $0x350] sm:$0xff]  ;;  %v100_v23 = vld [vmem:[%s1675_s3 + $0x18] sm:$0xff] }
  0x15   :  { %334 = vmatprep.subr.mxu0 %v116_v63  ;;  %401 = vmatprep.subr.mxu1 %v218_v0  ;;  %v202_v24 = vld [vmem:[%s1675_s3 + $0x348] sm:$0xff]  ;;  %v200_v26 = vld [vmem:[%s1675_s3 + $0x338] sm:$0xff]  ;;  %v97_v27 = vld [vmem:[%s1675_s3] sm:$0xff] }
  0x16   :  { %335 = vmatpush1.msra.mxu0 %v115_v1  ;;  %402 = vmatpush1.msra.mxu1 %v217_v2  ;;  %v98_v25 = vld [vmem:[%s1675_s3 + $0x8] sm:$0xff]  ;;  %v199_v28 = vld [vmem:[%s1675_s3 + $0x330] sm:$0xff]  ;;  %v197_v30 = vld [vmem:[%s1675_s3 + $0x320] sm:$0xff] }
  0x17   :  { %336 = vmatprep.subr.mxu0 %v113_v3  ;;  %403 = vmatprep.subr.mxu1 %v215_v4  ;;  %v191_v29 = vld [vmem:[%s1675_s3 + $0x2f0] sm:$0xff]  ;;  %v190_v31 = vld [vmem:[%s1675_s3 + $0x2e8] sm:$0xff]  ;;  %v196_v32 = vld [vmem:[%s1675_s3 + $0x318] sm:$0xff] }
  0x18   :  { %337 = vmatpush1.msra.mxu0 %v112_v5  ;;  %404 = vmatpush1.msra.mxu1 %v214_v6  ;;  %v188_v33 = vld [vmem:[%s1675_s3 + $0x2d8] sm:$0xff]  ;;  %v194_v34 = vld [vmem:[%s1675_s3 + $0x308] sm:$0xff]  ;;  %v187_v35 = vld [vmem:[%s1675_s3 + $0x2d0] sm:$0xff] }
  0x19   :  { %338 = vmatprep.subr.mxu0 %v110_v7  ;;  %405 = vmatprep.subr.mxu1 %v212_v8  ;;  %v193_v36 = vld [vmem:[%s1675_s3 + $0x300] sm:$0xff]  ;;  %v287_v38 = vld [vmem:[%s1675_s3 + $0x5f0] sm:$0xff]  ;;  %v184_v39 = vld [vmem:[%s1675_s3 + $0x2b8] sm:$0xff] }
  0x1a   :  { %339 = vmatpush1.msra.mxu0 %v109_v9  ;;  %406 = vmatpush1.msra.mxu1 %v211_v10  ;;  %v185_v37 = vld [vmem:[%s1675_s3 + $0x2c0] sm:$0xff]  ;;  %v286_v40 = vld [vmem:[%s1675_s3 + $0x5e8] sm:$0xff]  ;;  %v284_v42 = vld [vmem:[%s1675_s3 + $0x5d8] sm:$0xff] }
  0x1b   :  { %340 = vmatprep.subr.mxu0 %v107_v11  ;;  %407 = vmatprep.subr.mxu1 %v209_v12  ;;  %v182_v41 = vld [vmem:[%s1675_s3 + $0x2a8] sm:$0xff]  ;;  %v181_v43 = vld [vmem:[%s1675_s3 + $0x2a0] sm:$0xff]  ;;  %v283_v44 = vld [vmem:[%s1675_s3 + $0x5d0] sm:$0xff] }
  0x1c   :  { %341 = vmatpush1.msra.mxu0 %v106_v13  ;;  %408 = vmatpush1.msra.mxu1 %v208_v14  ;;  %v179_v45 = vld [vmem:[%s1675_s3 + $0x290] sm:$0xff]  ;;  %v281_v46 = vld [vmem:[%s1675_s3 + $0x5c0] sm:$0xff]  ;;  %v178_v48 = vld [vmem:[%s1675_s3 + $0x288] sm:$0xff] }
  0x1d   :  { %342 = vmatprep.subr.mxu0 %v104_v15  ;;  %409 = vmatprep.subr.mxu1 %v206_v17  ;;  %v280_v49 = vld [vmem:[%s1675_s3 + $0x5b8] sm:$0xff]  ;;  %v278_v51 = vld [vmem:[%s1675_s3 + $0x5a8] sm:$0xff]  ;;  %v175_v54 = vld [vmem:[%s1675_s3 + $0x270] sm:$0xff] }
  0x1e   :  { %343 = vmatpush1.msra.mxu0 %v103_v18  ;;  %410 = vmatpush1.msra.mxu1 %v205_v19  ;;  %v176_v50 = vld [vmem:[%s1675_s3 + $0x278] sm:$0xff]  ;;  %v277_v55 = vld [vmem:[%s1675_s3 + $0x5a0] sm:$0xff]  ;;  %v275_v58 = vld [vmem:[%s1675_s3 + $0x590] sm:$0xff] }
  0x1f   :  { %344 = vmatprep.subr.mxu0 %v101_v20  ;;  %411 = vmatprep.subr.mxu1 %v203_v21  ;;  %v173_v56 = vld [vmem:[%s1675_s3 + $0x260] sm:$0xff]  ;;  %v172_v59 = vld [vmem:[%s1675_s3 + $0x258] sm:$0xff]  ;;  %v274_v60 = vld [vmem:[%s1675_s3 + $0x588] sm:$0xff] }
  0x20   :  { %345 = vmatpush1.msra.mxu0 %v100_v23  ;;  %412 = vmatpush1.msra.mxu1 %v202_v24  ;;  %v170_v61 = vld [vmem:[%s1675_s3 + $0x248] sm:$0xff]  ;;  %v272_v62 = vld [vmem:[%s1675_s3 + $0x578] sm:$0xff]  ;;  %v169_v63 = vld [vmem:[%s1675_s3 + $0x240] sm:$0xff] }
  0x21   :  { %346 = vmatprep.subr.mxu0 %v98_v25  ;;  %413 = vmatprep.subr.mxu1 %v200_v26  ;;  %v271_v0 = vld [vmem:[%s1675_s3 + $0x570] sm:$0xff]  ;;  %v269_v2 = vld [vmem:[%s1675_s3 + $0x560] sm:$0xff]  ;;  %v166_v3 = vld [vmem:[%s1675_s3 + $0x228] sm:$0xff] }
  0x22   :  { %347 = vmatpush1.msra.mxu0 %v97_v27  ;;  %414 = vmatpush1.msra.mxu1 %v199_v28  ;;  %v167_v1 = vld [vmem:[%s1675_s3 + $0x230] sm:$0xff]  ;;  %v268_v4 = vld [vmem:[%s1675_s3 + $0x558] sm:$0xff]  ;;  %v266_v6 = vld [vmem:[%s1675_s3 + $0x548] sm:$0xff] }
  0x23   :  { %348 = vmatprep.subr.mxu0 %v191_v29  ;;  %415 = vmatprep.subr.mxu1 %v197_v30  ;;  %v164_v5 = vld [vmem:[%s1675_s3 + $0x218] sm:$0xff]  ;;  %v163_v7 = vld [vmem:[%s1675_s3 + $0x210] sm:$0xff]  ;;  %v265_v8 = vld [vmem:[%s1675_s3 + $0x540] sm:$0xff] }
  0x24   :  { %349 = vmatpush2.msra.mxu0 %v190_v31  ;;  %416 = vmatpush1.msra.mxu1 %v196_v32  ;;  %v161_v9 = vld [vmem:[%s1675_s3 + $0x200] sm:$0xff]  ;;  %v263_v10 = vld [vmem:[%s1675_s3 + $0x530] sm:$0xff]  ;;  %v160_v11 = vld [vmem:[%s1675_s3 + $0x1f8] sm:$0xff] }
  0x25   :  { %350 = vmatprep.subr.mxu0 %v188_v33  ;;  %417 = vmatprep.subr.mxu1 %v194_v34  ;;  %v262_v12 = vld [vmem:[%s1675_s3 + $0x528] sm:$0xff]  ;;  %v260_v15 = vld [vmem:[%s1675_s3 + $0x518] sm:$0xff]  ;;  %v157_v17 = vld [vmem:[%s1675_s3 + $0x1e0] sm:$0xff] }
  0x26   :  { %351 = vmatpush2.msra.mxu0 %v187_v35  ;;  %418 = vmatpush1.msra.mxu1 %v193_v36  ;;  %v158_v13 = vld [vmem:[%s1675_s3 + $0x1e8] sm:$0xff]  ;;  %v259_v18 = vld [vmem:[%s1675_s3 + $0x510] sm:$0xff]  ;;  %v257_v21 = vld [vmem:[%s1675_s3 + $0x500] sm:$0xff] }
  0x27   :  { %352 = vmatprep.subr.mxu0 %v185_v37  ;;  %419 = vmatprep.subr.mxu1 %v287_v38  ;;  %v757_v14 = vld [vmem:[%s1674_s2 + $0x8] ss:$0 sm:$0xff]  ;;  %v155_v19 = vld [vmem:[%s1675_s3 + $0x1d0] sm:$0xff]  ;;  %v256_v23 = vld [vmem:[%s1675_s3 + $0x4f8] sm:$0xff] }
  0x28   :  { %353 = vmatpush2.msra.mxu0 %v184_v39  ;;  %420 = vmatpush2.msra.mxu1 %v286_v40  ;;  %vm74_vm8 = vcmp.eq.s32.totalorder %v964_v16, %v757_v14  ;;  %v154_v16 = vld [vmem:[%s1675_s3 + $0x1c8] sm:$0xff]  ;;  %v151_v25 = vld [vmem:[%s1675_s3 + $0x1b0] sm:$0xff]  ;;  %v253_v26 = vld [vmem:[%s1675_s3 + $0x4e0] sm:$0xff] }
  0x29   :  { %354 = vmatprep.subr.mxu0 %v182_v41  ;;  %421 = vmatprep.subr.mxu1 %v284_v42  ;;  %v1312_v20 = vsel %vm74_vm8, %v978_v22, 0.0  ;;  %v152_v22 = vld [vmem:[%s1675_s3 + $0x1b8] sm:$0xff]  ;;  %v254_v24 = vld [vmem:[%s1675_s3 + $0x4e8] sm:$0xff]  ;;  %v149_v27 = vld [vmem:[%s1675_s3 + $0x1a0] sm:$0xff] }
  0x2a   :  { %355 = vmatpush2.msra.mxu0 %v181_v43  ;;  %422 = vmatpush2.msra.mxu1 %v283_v44  ;;  %v251_v28 = vld [vmem:[%s1675_s3 + $0x4d0] sm:$0xff]  ;;  %v148_v29 = vld [vmem:[%s1675_s3 + $0x198] sm:$0xff]  ;;  %v250_v30 = vld [vmem:[%s1675_s3 + $0x4c8] sm:$0xff] }
  0x2b   :  { %356 = vmatprep.subr.mxu0 %v179_v45  ;;  %423 = vmatprep.subr.mxu1 %v281_v46  ;;  %v146_v31 = vld [vmem:[%s1675_s3 + $0x188] sm:$0xff]  ;;  %v248_v32 = vld [vmem:[%s1675_s3 + $0x4b8] sm:$0xff]  ;;  %v145_v33 = vld [vmem:[%s1675_s3 + $0x180] sm:$0xff] }
  0x2c   :  { %357 = vmatpush2.msra.mxu0 %v178_v48  ;;  %424 = vmatpush2.msra.mxu1 %v280_v49  ;;  %v247_v34 = vld [vmem:[%s1675_s3 + $0x4b0] sm:$0xff]  ;;  %v245_v36 = vld [vmem:[%s1675_s3 + $0x4a0] sm:$0xff]  ;;  %v244_v37 = vld [vmem:[%s1675_s3 + $0x498] sm:$0xff] }
  0x2d   :  { %358 = vmatprep.subr.mxu0 %v176_v50  ;;  %425 = vmatprep.subr.mxu1 %v278_v51  ;;  %v311_v35 = vld [vmem:[%s1675_s3 + $0x6b0] sm:$0xff]  ;;  %v242_v38 = vld [vmem:[%s1675_s3 + $0x488] sm:$0xff]  ;;  %v241_v39 = vld [vmem:[%s1675_s3 + $0x480] sm:$0xff] }
  0x2e   :  { %359 = vmatpush2.msra.mxu0 %v175_v54  ;;  %426 = vmatpush2.msra.mxu1 %v277_v55  ;;  %v192_v40 = vld [vmem:[%s1675_s3 + $0x2f8] sm:$0xff] }
  0x2f   :  { %360 = vmatprep.subr.mxu0 %v173_v56  ;;  %427 = vmatprep.subr.mxu1 %v275_v58 }
  0x30   :  { %361 = vmatpush2.msra.mxu0 %v172_v59  ;;  %428 = vmatpush2.msra.mxu1 %v274_v60 }
  0x31   :  { %362 = vmatprep.subr.mxu0 %v170_v61  ;;  %429 = vmatprep.subr.mxu1 %v272_v62 }
  0x32   :  { %363 = vmatpush2.msra.mxu0 %v169_v63  ;;  %430 = vmatpush2.msra.mxu1 %v271_v0 }
  0x33   :  { %364 = vmatprep.subr.mxu0 %v167_v1  ;;  %431 = vmatprep.subr.mxu1 %v269_v2 }
  0x34   :  { %365 = vmatpush2.msra.mxu0 %v166_v3  ;;  %432 = vmatpush2.msra.mxu1 %v268_v4 }
  0x35   :  { %366 = vmatprep.subr.mxu0 %v164_v5  ;;  %433 = vmatprep.subr.mxu1 %v266_v6 }
  0x36   :  { %367 = vmatpush2.msra.mxu0 %v163_v7  ;;  %434 = vmatpush2.msra.mxu1 %v265_v8 }
  0x37   :  { %368 = vmatprep.subr.mxu0 %v161_v9  ;;  %435 = vmatprep.subr.mxu1 %v263_v10 }
  0x38   :  { %369 = vmatpush2.msra.mxu0 %v160_v11  ;;  %436 = vmatpush2.msra.mxu1 %v262_v12 }
  0x39   :  { %370 = vmatprep.subr.mxu0 %v158_v13  ;;  %437 = vmatprep.subr.mxu1 %v260_v15 }
  0x3a   :  { %371 = vmatpush2.msra.mxu0 %v157_v17  ;;  %438 = vmatpush2.msra.mxu1 %v259_v18 }
  0x3b   :  { %372 = vmatprep.subr.mxu0 %v155_v19  ;;  %439 = vmatprep.subr.mxu1 %v257_v21 }
  0x3c   :  { %373 = vmatpush2.msra.mxu0 %v154_v16  ;;  %440 = vmatpush2.msra.mxu1 %v256_v23 }
  0x3d   :  { %374 = vmatprep.subr.mxu0 %v152_v22  ;;  %441 = vmatprep.subr.mxu1 %v254_v24 }
  0x3e   :  { %375 = vmatpush2.msra.mxu0 %v151_v25  ;;  %442 = vmatpush2.msra.mxu1 %v253_v26 }
  0x3f   :  { %376 = vmatprep.subr.mxu0 %v149_v27  ;;  %443 = vmatprep.subr.mxu1 %v251_v28 }
  0x40   :  { %377 = vmatpush2.msra.mxu0 %v148_v29  ;;  %444 = vmatpush2.msra.mxu1 %v250_v30 }
  0x41   :  { %378 = vmatprep.subr.mxu0 %v146_v31  ;;  %445 = vmatprep.subr.mxu1 %v248_v32 }
  0x42   :  { %379 = vmatpush2.msra.mxu0 %v145_v33  ;;  %446 = vmatpush2.msra.mxu1 %v247_v34 }
  0x43   :  { %474 = vmatprep.subr.mxu0 %v311_v35  ;;  %447 = vmatprep.subr.mxu1 %v245_v36 }
  0x44   :  { %448 = vmatpush2.msra.mxu1 %v244_v37 }
  0x45   :  { %449 = vmatprep.subr.mxu1 %v242_v38 }
  0x46   :  { %450 = vmatpush2.msra.mxu1 %v241_v39 }
  0x47   :  { %760 = vmatprep.subr.mxu1 %v192_v40 }
  0x48   :  { %9 = vsyncpa [#allocation3], 0  ;;  %vm92_vm9 = vcmask 523264   ;;  %v310_v46 = vld [vmem:[%s1675_s3 + $0x6a8] sm:$0xff]  ;;  %v308_v49 = vld [vmem:[%s1675_s3 + $0x698] sm:$0xff]  ;;  %v895_v54 = vmov 0.0  }
  0x49   :  { %v304_v58 = vld [vmem:[%s1675_s3 + $0x678] sm:$0xff]  ;;  %v301_v60 = vld [vmem:[%s1675_s3 + $0x660] sm:$0xff]  ;;  %v299_v62 = vld [vmem:[%s1675_s3 + $0x650] sm:$0xff]  ;;  %vm896_vm10 = vmmov 0   ;;  %vm741_vm11 = vcmask 269312  }
  0x4a   :  { %v144_v59 = vld [vmem:[%s1675_s3 + $0x178] sm:$0xff]  ;;  %v141_v61 = vld [vmem:[%s1675_s3 + $0x160] sm:$0xff]  ;;  %v186_v63 = vld [vmem:[%s1675_s3 + $0x2c8] sm:$0xff] }
  0x4b   :  { %v298_v0 = vld [vmem:[%s1675_s3 + $0x648] sm:$0xff]  ;;  %v296_v2 = vld [vmem:[%s1675_s3 + $0x638] sm:$0xff]  ;;  %v183_v3 = vld [vmem:[%s1675_s3 + $0x2b0] sm:$0xff] }
  0x4c   :  { %v138_v1 = vld [vmem:[%s1675_s3 + $0x148] sm:$0xff]  ;;  %v295_v4 = vld [vmem:[%s1675_s3 + $0x630] sm:$0xff]  ;;  %v293_v6 = vld [vmem:[%s1675_s3 + $0x620] sm:$0xff] }
  0x4d   :  { %v135_v5 = vld [vmem:[%s1675_s3 + $0x130] sm:$0xff]  ;;  %v180_v7 = vld [vmem:[%s1675_s3 + $0x298] sm:$0xff]  ;;  %v290_v10 = vld [vmem:[%s1675_s3 + $0x608] sm:$0xff] }
  0x4e   :  { %v292_v8 = vld [vmem:[%s1675_s3 + $0x618] sm:$0xff]  ;;  %v177_v11 = vld [vmem:[%s1675_s3 + $0x280] sm:$0xff]  ;;  %v174_v14 = vld [vmem:[%s1675_s3 + $0x268] sm:$0xff] }
  0x4f   :  { %v132_v9 = vld [vmem:[%s1675_s3 + $0x118] sm:$0xff]  ;;  %v289_v12 = vld [vmem:[%s1675_s3 + $0x600] sm:$0xff]  ;;  %v126_v17 = vld [vmem:[%s1675_s3 + $0xe8] sm:$0xff] }
  0x50   :  { %v129_v13 = vld [vmem:[%s1675_s3 + $0x100] sm:$0xff]  ;;  %v288_v15 = vld [vmem:[%s1675_s3 + $0x5f8] sm:$0xff]  ;;  %v171_v19 = vld [vmem:[%s1675_s3 + $0x250] sm:$0xff] }
  0x51   :  { %v240_v18 = vld [vmem:[%s1675_s3 + $0x478] sm:$0xff]  ;;  %v285_v21 = vld [vmem:[%s1675_s3 + $0x5e0] sm:$0xff]  ;;  %v123_v16 = vld [vmem:[%s1675_s3 + $0xd0] sm:$0xff] }
  0x52   :  { %v237_v23 = vld [vmem:[%s1675_s3 + $0x460] sm:$0xff]  ;;  %v168_v22 = vld [vmem:[%s1675_s3 + $0x238] sm:$0xff]  ;;  %v282_v24 = vld [vmem:[%s1675_s3 + $0x5c8] sm:$0xff] }
  0x53   :  { %v120_v25 = vld [vmem:[%s1675_s3 + $0xb8] sm:$0xff]  ;;  %v234_v26 = vld [vmem:[%s1675_s3 + $0x448] sm:$0xff]  ;;  %v165_v27 = vld [vmem:[%s1675_s3 + $0x220] sm:$0xff] }
  0x54   :  { %v279_v28 = vld [vmem:[%s1675_s3 + $0x5b0] sm:$0xff]  ;;  %v117_v29 = vld [vmem:[%s1675_s3 + $0xa0] sm:$0xff]  ;;  %v162_v31 = vld [vmem:[%s1675_s3 + $0x208] sm:$0xff] }
  0x55   :  { %v231_v30 = vld [vmem:[%s1675_s3 + $0x430] sm:$0xff]  ;;  %v276_v32 = vld [vmem:[%s1675_s3 + $0x598] sm:$0xff]  ;;  %v114_v33 = vld [vmem:[%s1675_s3 + $0x88] sm:$0xff] }
  0x56   :  { %v228_v34 = vld [vmem:[%s1675_s3 + $0x418] sm:$0xff]  ;;  %v159_v35 = vld [vmem:[%s1675_s3 + $0x1f0] sm:$0xff]  ;;  %v273_v36 = vld [vmem:[%s1675_s3 + $0x580] sm:$0xff] }
  0x57   :  { %v111_v37 = vld [vmem:[%s1675_s3 + $0x70] sm:$0xff]  ;;  %v225_v38 = vld [vmem:[%s1675_s3 + $0x400] sm:$0xff]  ;;  %v156_v39 = vld [vmem:[%s1675_s3 + $0x1d8] sm:$0xff] }
  0x58   :  { %v270_v40 = vld [vmem:[%s1675_s3 + $0x568] sm:$0xff] }
  0x7e   :  { %v864_v41 = vpop.permute.xlu0 %863 }
  0x7f   :  { %v866_v42 = vunpack.i.h.bf16 %v864_v41  ;;  %v865_v43 = vunpack.i.l.bf16 %v864_v41  ;;  %v108_v41 = vld [vmem:[%s1675_s3 + $0x58] sm:$0xff] }
  0x81   :  { %v94_v44 = vsel %vm92_vm9, %v1031_v47, %v865_v43  ;;  %v1381_v45 = vsel %vm92_vm9, %v1043_v52, %v866_v42  ;;  %v307_v47 = vld [vmem:[%s1675_s3 + $0x690] sm:$0xff]  ;;  %v305_v52 = vld [vmem:[%s1675_s3 + $0x680] sm:$0xff]  ;;  %v222_v42 = vld [vmem:[%s1675_s3 + $0x3e8] sm:$0xff] }
  0x82   :  { %v869_v48 = vpop.permute.xlu0 %868  ;;  %380 = vmatprep.mubr.f32.mxu0 %v94_v44  ;;  %v153_v43 = vld [vmem:[%s1675_s3 + $0x1c0] sm:$0xff] }
  0x83   :  { %v871_v50 = vunpack.i.h.bf16 %v869_v48  ;;  %v870_v51 = vunpack.i.l.bf16 %v869_v48  ;;  %381 = vmatmul.mubr.f32.vlgmr.msra.gmra.mxu0 %v1381_v45  ;;  %v219_v48 = vld [vmem:[%s1675_s3 + $0x3d0] sm:$0xff] }
  0x84   :  { %475 = vmatpush1.msra.mxu0 %v310_v46  ;;  %522 = vmatprep.mubr.f32.mxu0 %v895_v54  ;;  %v105_v46 = vld [vmem:[%s1675_s3 + $0x40] sm:$0xff] }
  0x85   :  { %476 = vmatprep.subr.mxu0 %v308_v49  ;;  %v1399_v55 = vsel %vm92_vm9, %v1046_v53, %v870_v51  ;;  %v1403_v56 = vsel %vm92_vm9, %v1059_v57, %v871_v50  ;;  %v302_v53 = vld [vmem:[%s1675_s3 + $0x668] sm:$0xff]  ;;  %v189_v57 = vld [vmem:[%s1675_s3 + $0x2e0] sm:$0xff]  ;;  %v264_v50 = vld [vmem:[%s1675_s3 + $0x538] sm:$0xff] }
  0x86   :  { %477 = vmatpush1.msra.mxu0 %v307_v47  ;;  %451 = vmatprep.mubr.f32.mxu1 %v1399_v55  ;;  %v150_v49 = vld [vmem:[%s1675_s3 + $0x1a8] sm:$0xff]  ;;  %v216_v47 = vld [vmem:[%s1675_s3 + $0x3b8] sm:$0xff] }
  0x87   :  { %478 = vmatprep.subr.mxu0 %v305_v52  ;;  %452 = vmatmul.mubr.f32.vlgmr.msra.gmra.mxu1 %v1403_v56  ;;  %v102_v51 = vld [vmem:[%s1675_s3 + $0x28] sm:$0xff]  ;;  %v147_v52 = vld [vmem:[%s1675_s3 + $0x190] sm:$0xff] }
  0x88   :  { %479 = vmatpush1.msra.mxu0 %v304_v58  ;;  %761 = vmatpush3.msra.mxu1 %v144_v59  ;;  %v99_v58 = vld [vmem:[%s1675_s3 + $0x10] sm:$0xff]  ;;  %v213_v59 = vld [vmem:[%s1675_s3 + $0x3a0] sm:$0xff] }
  0x89   :  { %480 = vmatprep.subr.mxu0 %v302_v53  ;;  %762 = vmatprep.subr.mxu1 %v189_v57  ;;  %v258_v53 = vld [vmem:[%s1675_s3 + $0x508] sm:$0xff] }
  0x8a   :  { %593 = vmatprep.mubr.f32.mxu1 %v94_v44  ;;  %481 = vmatpush1.msra.mxu0 %v301_v60  ;;  %v267_v44 = vld [vmem:[%s1675_s3 + $0x550] sm:$0xff]  ;;  %v210_v57 = vld [vmem:[%s1675_s3 + $0x388] sm:$0xff]  ;;  %v312_v60 = vld [vmem:[%s1675_s3 + $0x6b8] sm:$0xff] }
  0x8b   :  { %763 = vmatpush3.msra.mxu1 %v141_v61  ;;  %482 = vmatprep.subr.mxu0 %v299_v62  ;;  %v255_v61 = vld [vmem:[%s1675_s3 + $0x4f0] sm:$0xff] }
  0x8c   :  { %764 = vmatprep.subr.mxu1 %v186_v63  ;;  %483 = vmatpush1.msra.mxu0 %v298_v0  ;;  %v207_v62 = vld [vmem:[%s1675_s3 + $0x370] sm:$0xff]  ;;  %v309_v63 = vld [vmem:[%s1675_s3 + $0x6a0] sm:$0xff]  ;;  %v204_v0 = vld [vmem:[%s1675_s3 + $0x358] sm:$0xff] }
  0x8d   :  { %765 = vmatpush3.msra.mxu1 %v138_v1  ;;  %484 = vmatprep.subr.mxu0 %v296_v2  ;;  %v306_v1 = vld [vmem:[%s1675_s3 + $0x688] sm:$0xff]  ;;  %v249_v2 = vld [vmem:[%s1675_s3 + $0x4c0] sm:$0xff] }
  0x8e   :  { %766 = vmatprep.subr.mxu1 %v183_v3  ;;  %485 = vmatpush1.msra.mxu0 %v295_v4  ;;  %v201_v3 = vld [vmem:[%s1675_s3 + $0x340] sm:$0xff]  ;;  %v303_v4 = vld [vmem:[%s1675_s3 + $0x670] sm:$0xff] }
  0x8f   :  { %767 = vmatpush3.msra.mxu1 %v135_v5  ;;  %486 = vmatprep.subr.mxu0 %v293_v6  ;;  %v246_v5 = vld [vmem:[%s1675_s3 + $0x4a8] sm:$0xff] }
  0x90   :  { %768 = vmatprep.subr.mxu1 %v180_v7  ;;  %487 = vmatpush1.msra.mxu0 %v292_v8  ;;  %v198_v6 = vld [vmem:[%s1675_s3 + $0x328] sm:$0xff]  ;;  %v300_v7 = vld [vmem:[%s1675_s3 + $0x658] sm:$0xff]  ;;  %v243_v8 = vld [vmem:[%s1675_s3 + $0x490] sm:$0xff] }
  0x91   :  { %769 = vmatpush3.msra.mxu1 %v132_v9  ;;  %488 = vmatprep.subr.mxu0 %v290_v10  ;;  %v195_v9 = vld [vmem:[%s1675_s3 + $0x310] sm:$0xff]  ;;  %v297_v10 = vld [vmem:[%s1675_s3 + $0x640] sm:$0xff] }
  0x92   :  { %770 = vmatprep.subr.mxu1 %v177_v11  ;;  %489 = vmatpush1.msra.mxu0 %v289_v12  ;;  %v294_v11 = vld [vmem:[%s1675_s3 + $0x628] sm:$0xff]  ;;  %v291_v12 = vld [vmem:[%s1675_s3 + $0x610] sm:$0xff] }
  0x93   :  { %771 = vmatpush3.msra.mxu1 %v129_v13  ;;  %758 = vmatmul.mubr.msk.f32.vlgmr.msra.gmra.mxu0 %vm92_vm9, %v1312_v20 }
  0x94   :  { %772 = vmatprep.subr.mxu1 %v174_v14  ;;  %795 = vmatprep.subr.mxu0 %v288_v15 }
  0x95   :  { %773 = vmatpush3.msra.mxu1 %v126_v17  ;;  %796 = vmatpush3.msra.mxu0 %v240_v18 }
  0x96   :  { %663 = vmatprep.mubr.f32.mxu0 %v1399_v55  ;;  %774 = vmatprep.subr.mxu1 %v171_v19  ;;  %v261_v55 = vld [vmem:[%s1675_s3 + $0x520] sm:$0xff] }
  0x97   :  { %797 = vmatprep.subr.mxu0 %v285_v21  ;;  %775 = vmatpush3.msra.mxu1 %v123_v16 }
  0x98   :  { %798 = vmatpush3.msra.mxu0 %v237_v23  ;;  %776 = vmatprep.subr.mxu1 %v168_v22 }
  0x99   :  { %799 = vmatprep.subr.mxu0 %v282_v24  ;;  %777 = vmatpush3.msra.mxu1 %v120_v25 }
  0x9a   :  { %800 = vmatpush3.msra.mxu0 %v234_v26  ;;  %778 = vmatprep.subr.mxu1 %v165_v27 }
  0x9b   :  { %801 = vmatprep.subr.mxu0 %v279_v28  ;;  %779 = vmatpush3.msra.mxu1 %v117_v29 }
  0x9c   :  { %802 = vmatpush3.msra.mxu0 %v231_v30  ;;  %780 = vmatprep.subr.mxu1 %v162_v31 }
  0x9d   :  { %803 = vmatprep.subr.mxu0 %v276_v32  ;;  %781 = vmatpush3.msra.mxu1 %v114_v33 }
  0x9e   :  { %804 = vmatpush3.msra.mxu0 %v228_v34  ;;  %782 = vmatprep.subr.mxu1 %v159_v35 }
  0x9f   :  { %805 = vmatprep.subr.mxu0 %v273_v36  ;;  %783 = vmatpush3.msra.mxu1 %v111_v37 }
  0xa0   :  { %806 = vmatpush3.msra.mxu0 %v225_v38  ;;  %784 = vmatprep.subr.mxu1 %v156_v39 }
  0xa1   :  { %807 = vmatprep.subr.mxu0 %v270_v40  ;;  %785 = vmatpush3.msra.mxu1 %v108_v41 }
  0xa2   :  { %808 = vmatpush3.msra.mxu0 %v222_v42  ;;  %786 = vmatprep.subr.mxu1 %v153_v43 }
  0xa3   :  { %809 = vmatprep.subr.mxu0 %v267_v44  ;;  %787 = vmatpush3.msra.mxu1 %v105_v46 }
  0xa4   :  { %810 = vmatpush3.msra.mxu0 %v219_v48  ;;  %788 = vmatprep.subr.mxu1 %v150_v49 }
  0xa5   :  { %811 = vmatprep.subr.mxu0 %v264_v50  ;;  %789 = vmatpush3.msra.mxu1 %v102_v51 }
  0xa6   :  { %812 = vmatpush3.msra.mxu0 %v216_v47  ;;  %790 = vmatprep.subr.mxu1 %v147_v52 }
  0xa7   :  { %813 = vmatprep.subr.mxu0 %v261_v55  ;;  %791 = vmatpush3.msra.mxu1 %v99_v58 }
  0xa8   :  { %814 = vmatpush3.msra.mxu0 %v213_v59  ;;  %594 = vmatmul.mubr.f32.vlgmr.msra.gmra.mxu1 %v1381_v45  ;;  %v252_v45 = vld [vmem:[%s1675_s3 + $0x4d8] sm:$0xff]  ;;  %s897_s3 = smov [#allocation2]  }
  0xa9   :  { %815 = vmatprep.subr.mxu0 %v258_v53  ;;  %839 = vmatprep.subr.mxu1 %v895_v54  ;;  %s749_s28 = sshll.u32 %s897_s3, 4  ;;  %s750_s28 = int_to_ptr.vmem [resolvable:$true] %s749_s28 }
  0xaa   :  { %816 = vmatpush3.msra.mxu0 %v210_v57  ;;  %840 = vmatpush3.msra.mxu1 %v312_v60  ;;  %s872_s29 = scalar_lea.vmem %s750_s28, 384  ;;  %p877_p1 = scmp.lt.s32.totalorder %s750_s28, %s750_s28 }
  0xab   :  { %817 = vmatprep.subr.mxu0 %v255_v61  ;;  %841 = vmatprep.subr.mxu1 %v895_v54  ;;  %p873_p0 = scmp.ne.s32.totalorder %s750_s28, %s872_s29  ;;  %p878_p2 = scmp.lt.s32.totalorder %s872_s29, %s872_s29 }
  0xac   :  { %818 = vmatpush3.msra.mxu0 %v207_v62  ;;  %842 = vmatpush3.msra.mxu1 %v309_v63 }
  0xad   :  { %819 = vmatprep.subr.mxu0 %v252_v45  ;;  %843 = vmatprep.subr.mxu1 %v895_v54  ;;  %p879_p3 = por %p878_p2, %p877_p1 }
  0xae   :  { %820 = vmatpush3.msra.mxu0 %v204_v0  ;;  %844 = vmatpush3.msra.mxu1 %v306_v1 }
  0xaf   :  { %821 = vmatprep.subr.mxu0 %v249_v2  ;;  %845 = vmatprep.subr.mxu1 %v895_v54  ;;  %p880_p4 = pnand %p879_p3, %p873_p0 }
  0xb0   :  { %822 = vmatpush3.msra.mxu0 %v201_v3  ;;  %846 = vmatpush3.msra.mxu1 %v303_v4 }
  0xb1   :  { %823 = vmatprep.subr.mxu0 %v246_v5  ;;  %847 = vmatprep.subr.mxu1 %v895_v54 }
  0xb2   :  { %824 = vmatpush3.msra.mxu0 %v198_v6  ;;  %848 = vmatpush3.msra.mxu1 %v300_v7 }
  0xb3   :  { %825 = vmatprep.subr.mxu0 %v243_v8  ;;  %849 = vmatprep.subr.mxu1 %v895_v54 }
  0xb4   :  { %826 = vmatpush3.msra.mxu0 %v195_v9  ;;  %850 = vmatpush3.msra.mxu1 %v297_v10 }
  0xb5   :  { %664 = vmatmul.mubr.f32.vlgmr.msra.gmra.mxu0 %v1403_v56  ;;  %851 = vmatprep.subr.mxu1 %v895_v54 }
  0xb6   :  { %852 = vmatpush3.msra.mxu1 %v294_v11  ;;  %855 = vmatprep.mubr.msk.f32.mxu1 %vm896_vm10, %v895_v54 }
  0xb7   :  { %853 = vmatprep.subr.mxu1 %v895_v54 }
  0xb8   :  { %854 = vmatpush3.msra.mxu1 %v291_v12 }
  0xb9   :  { %856 = vmatmul.mubr.msk.f32.vlgmr.msra.gmra.mxu1 %vm92_vm9, %v1312_v20 }
 0x143   :  { %v382_v13 = vpop.f32.mrf.mxu0 }
 0x145   :  { %v384_v15 = vpop.f32.mrf.mxu0 }
 0x147   :  { %v453_v14 = vpop.f32.mrf.mxu1 }
 0x148   :  { %v454_v17 = vadd.f32 %v453_v14, %v382_v13 }
 0x149   :  { %v455_v56 = vpop.f32.mrf.mxu1 }
 0x14a   :  { %v456_v19 = vadd.f32 %v455_v56, %v384_v15 }
 0x153   :  { %v524_v18 = vpop.f32.mrf.mxu0 }
 0x154   :  { %v525_v21 = vadd.f32 %v524_v18, %v454_v17 }
 0x155   :  { %v526_v16 = vpop.f32.mrf.mxu0 }
 0x156   :  { %739 = vst [vmem:[#allocation2] sm:$0xff] %v525_v21  ;;  %v527_v23 = vadd.f32 %v526_v16, %v456_v19 }
 0x158   :  { %740 = vst [vmem:[#allocation2 + $0x8] sm:$0xff] %v527_v23 }
 0x168   :  { %v792_v22 = vpop.f32.mrf.mxu1 }
 0x16a   :  { %v793_v24 = vpop.f32.mrf.mxu1 }
 0x16b   :  { %v794_v26 = vadd.f32 %v793_v24, %v792_v22 }
 0x175   :  { %v827_v25 = vpop.f32.mrf.mxu0 }
 0x177   :  { %v828_v54 = vpop.f32.mrf.mxu0 }
 0x178   :  { %v829_v27 = vadd.f32 %v828_v54, %v827_v25 }
 0x179   :  { %v735_v28 = vpop.f32.mrf.mxu1 }
 0x17a   :  { %v666_v20 = vadd.f32 %v829_v27, %v794_v26 }
 0x17b   :  { %v857_v29 = vpop.f32.mrf.mxu1 }
 0x17c   :  { %v736_v30 = vadd.f32 %v735_v28, %v666_v20 }
 0x17e   :  { %742 = vst.msk [vmem:[#allocation2 + $0x10] sm:$0xff] %vm741_vm11, %v736_v30 }
 0x17f   :  { %883 = shalt.err (!%p880_p4)
}
 0x180   :  { %752 = dma.vmem_to_hbm [thread:$0]  %s750_s28, 384, %s1676_s4, [#allocation3]  }
 0x181   :  { %892 = dma.done.wait [#allocation3], 384  }
 0x182   :  { %893 = vsyncadd [#allocation3], 4294966912 }
 0x183   :  { %756 = vsyncpa [#allocation3], 1 }

</bundles_post_ra>
